<compile_context>
chip_gen: v5e
topology: v5e:2x2
jax: 0.10.0
libtpu: 0.0.40
codegen_flags: <defaults>
</compile_context>

<pallas_src>
import functools

import jax
import jax.numpy as jnp
from jax.experimental import pallas as pl
from jax.experimental.pallas import tpu as pltpu


def _layernorm(x, gamma, beta, eps=1e-5):
    mean = jnp.mean(x, axis=-1, keepdims=True)
    var = jnp.mean((x - mean) ** 2, axis=-1, keepdims=True)
    return (x - mean) * jax.lax.rsqrt(var + eps) * gamma + beta


def token_attention_kernel(x_ref, wq_ref, bq_ref, wk_ref, bk_ref, wv_ref, bv_ref,
                           qg_ref, qb_ref, kg_ref, kb_ref, wp_ref, bp_ref,
                           o_ref,
                           kcache_ref, vcache_ref, acc_ref,
                           *, tq, eps):
    qt = pl.program_id(1)
    h = pl.program_id(2)
    num_heads = pl.num_programs(2)

    # Zero the per-q-tile output accumulator at the first head.
    @pl.when(h == 0)
    def _():
        acc_ref[...] = jnp.zeros_like(acc_ref)

    # At the first q tile of each batch element, (re)build this head's K / V
    # for the whole sequence and cache them in bf16 for the remaining q tiles.
    @pl.when(qt == 0)
    def _():
        xb = x_ref[0].astype(jnp.bfloat16)                            # (N, C)
        k_h = jnp.dot(xb, wk_ref[0],
                      preferred_element_type=jnp.float32) + bk_ref[0]  # (N, Dh)
        k_h = _layernorm(k_h, kg_ref[...], kb_ref[...], eps)
        v_h = jnp.dot(xb, wv_ref[0],
                      preferred_element_type=jnp.float32) + bv_ref[0]  # (N, Dh)
        kcache_ref[h] = k_h.astype(jnp.bfloat16)
        vcache_ref[h] = v_h.astype(jnp.bfloat16)

    # Q for this q tile / head (attention scale already folded into gamma/beta).
    row0 = pl.multiple_of(qt * tq, tq)
    xq = x_ref[0, pl.ds(row0, tq), :].astype(jnp.bfloat16)             # (tq, C)
    q_h = jnp.dot(xq, wq_ref[0],
                  preferred_element_type=jnp.float32) + bq_ref[0]      # (tq, Dh)
    q_h = _layernorm(q_h, qg_ref[...], qb_ref[...], eps)

    k_h = kcache_ref[h]                                                # (N, Dh) bf16
    v_h = vcache_ref[h]                                                # (N, Dh) bf16

    # Scores: contract the last dims of q and k (no materialized transpose).
    s = jax.lax.dot_general(q_h.astype(jnp.bfloat16), k_h,
                            dimension_numbers=(((1,), (1,)), ((), ())),
                            preferred_element_type=jnp.float32)        # (tq, N)
    s = s - jnp.max(s, axis=-1, keepdims=True)
    p = jnp.exp(s)
    p = p * pl.reciprocal(jnp.sum(p, axis=-1, keepdims=True), approx=True)

    oh = jnp.dot(p.astype(jnp.bfloat16), v_h,
                 preferred_element_type=jnp.float32)                   # (tq, Dh)

    # Per-head slice of the output projection, accumulated over heads so the
    # head-concat never materializes.
    acc_ref[...] += jnp.dot(oh.astype(jnp.bfloat16), wp_ref[0],
                            preferred_element_type=jnp.float32)        # (tq, C)

    @pl.when(h == num_heads - 1)
    def _():
        o_ref[0] = (acc_ref[...] + bp_ref[...]).astype(o_ref.dtype)
    # attn_drop / proj_drop have p=0.0 -> identity; return_attention=False path.


def _pick_q_tile(n):
    for cand in (256, 128, 64, 32, 16, 8):
        if n >= cand and n % cand == 0:
            return cand
    return n


def token_attention_hacker(x, params, num_heads):
    """x: (B, N, C) float32.  params: dict of (in, out)-layout weights."""
    B, N, C = x.shape
    head_dim = C // num_heads
    scale = head_dim ** (-0.5)
    tq = _pick_q_tile(N)
    num_q_tiles = N // tq

    wqkv = params["wqkv"]                     # (C, 3C), (in, out) layout
    bqkv = params["bqkv"]                     # (3C,)

    def per_head_w(w):                        # (C, C) -> (H, C, Dh) bf16
        return jnp.transpose(w.reshape(C, num_heads, head_dim),
                             (1, 0, 2)).astype(jnp.bfloat16)

    wq = per_head_w(wqkv[:, 0:C])
    wk = per_head_w(wqkv[:, C:2 * C])
    wv = per_head_w(wqkv[:, 2 * C:3 * C])
    bq = bqkv[0:C].reshape(num_heads, 1, head_dim)
    bk = bqkv[C:2 * C].reshape(num_heads, 1, head_dim)
    bv = bqkv[2 * C:3 * C].reshape(num_heads, 1, head_dim)

    # Fold the attention scale into the q LayerNorm affine.
    qg = (params["q_gamma"] * scale).reshape(1, head_dim)
    qb = (params["q_beta"] * scale).reshape(1, head_dim)
    kg = params["k_gamma"].reshape(1, head_dim)
    kb = params["k_beta"].reshape(1, head_dim)

    # Output projection decomposed by the head that feeds it: (H, Dh, C) bf16.
    wp = params["wproj"].reshape(num_heads, head_dim, C).astype(jnp.bfloat16)
    bp = params["bproj"].reshape(1, C)

    kernel = functools.partial(token_attention_kernel, tq=tq, eps=1e-5)

    head_spec = lambda shape: pl.BlockSpec(shape, lambda b, qt, h: (h, 0, 0))
    const_spec = lambda shape: pl.BlockSpec(shape, lambda b, qt, h: (0, 0))

    return pl.pallas_call(
        kernel,
        out_shape=jax.ShapeDtypeStruct((B, N, C), x.dtype),
        grid=(B, num_q_tiles, num_heads),
        in_specs=[
            pl.BlockSpec((1, N, C), lambda b, qt, h: (b, 0, 0)),   # x (resident per b)
            head_spec((1, C, head_dim)),                           # wq  (per head)
            head_spec((1, 1, head_dim)),                           # bq
            head_spec((1, C, head_dim)),                           # wk
            head_spec((1, 1, head_dim)),                           # bk
            head_spec((1, C, head_dim)),                           # wv
            head_spec((1, 1, head_dim)),                           # bv
            const_spec((1, head_dim)),                             # q_gamma * scale
            const_spec((1, head_dim)),                             # q_beta * scale
            const_spec((1, head_dim)),                             # k_gamma
            const_spec((1, head_dim)),                             # k_beta
            head_spec((1, head_dim, C)),                           # wproj (per head)
            const_spec((1, C)),                                    # bproj
        ],
        out_specs=pl.BlockSpec((1, tq, C), lambda b, qt, h: (b, qt, 0)),
        scratch_shapes=[
            pltpu.VMEM((num_heads, N, head_dim), jnp.bfloat16),    # K cache
            pltpu.VMEM((num_heads, N, head_dim), jnp.bfloat16),    # V cache
            pltpu.VMEM((tq, C), jnp.float32),                      # output accumulator
        ],
        compiler_params=pltpu.CompilerParams(
            dimension_semantics=("parallel", "arbitrary", "arbitrary"),
            vmem_limit_bytes=32 * 1024 * 1024),
    )(x, wq, bq, wk, bk, wv, bv, qg, qb, kg, kb, wp, bp)


def reference_forward(x, params, num_heads):
    """Pure-JAX f32 mirror of the PyTorch forward for verification."""
    B, N, C = x.shape
    head_dim = C // num_heads
    scale = head_dim ** (-0.5)
    qkv = x @ params["wqkv"] + params["bqkv"]                       # (B, N, 3C)
    qkv = qkv.reshape(B, N, 3, num_heads, head_dim).transpose(2, 0, 3, 1, 4)
    q, k, v = qkv[0], qkv[1], qkv[2]                                # (B, H, N, Dh)
    q = _layernorm(q, params["q_gamma"], params["q_beta"])
    k = _layernorm(k, params["k_gamma"], params["k_beta"])
    q = q * scale
    attn = jax.nn.softmax(q @ jnp.swapaxes(k, -2, -1), axis=-1)
    out = attn @ v                                                  # (B, H, N, Dh)
    out = out.transpose(0, 2, 1, 3).reshape(B, N, C)
    return out @ params["wproj"] + params["bproj"]


if __name__ == "__main__":
    B, N, C = 2, 8, 32
    num_heads = 4
    head_dim = C // num_heads

    key = jax.random.PRNGKey(0)
    k_x, k_wqkv, k_bqkv, k_wproj, k_bproj = jax.random.split(key, 5)

    x = jax.random.normal(k_x, (B, N, C), dtype=jnp.float32)

    params = {
        # Linear weights stored as (in, out) — already transposed vs PyTorch.
        "wqkv": 0.05 * jax.random.normal(k_wqkv, (C, 3 * C), dtype=jnp.float32),
        "bqkv": 0.05 * jax.random.normal(k_bqkv, (3 * C,), dtype=jnp.float32),
        # nn.LayerNorm default init: weight=1, bias=0.
        "q_gamma": jnp.ones((head_dim,), dtype=jnp.float32),
        "q_beta": jnp.zeros((head_dim,), dtype=jnp.float32),
        "k_gamma": jnp.ones((head_dim,), dtype=jnp.float32),
        "k_beta": jnp.zeros((head_dim,), dtype=jnp.float32),
        "wproj": 0.05 * jax.random.normal(k_wproj, (C, C), dtype=jnp.float32),
        "bproj": 0.05 * jax.random.normal(k_bproj, (C,), dtype=jnp.float32),
    }

    out = token_attention_hacker(x, params, num_heads)
    out = jax.block_until_ready(out)

    ref = reference_forward(x, params, num_heads)
    assert out.shape == (B, N, C)
    # bf16 MXU operands + approx reciprocal -> looser tolerance than pure f32.
    assert jnp.allclose(out, ref, atol=3e-2, rtol=3e-2), "mismatch vs JAX reference"

    print("KERNEL_OK")
</pallas_src>

<mosaic_0001>
module attributes {stable_mosaic.version = 11 : i64} {
  func.func @token_attention_kernel(%arg0: i32, %arg1: i32, %arg2: i32, %arg3: memref<1x8x32xf32, #tpu.memory_space<vmem>>, %arg4: memref<1x32x8xbf16, #tpu.memory_space<vmem>>, %arg5: memref<1x1x8xf32, #tpu.memory_space<vmem>>, %arg6: memref<1x32x8xbf16, #tpu.memory_space<vmem>>, %arg7: memref<1x1x8xf32, #tpu.memory_space<vmem>>, %arg8: memref<1x32x8xbf16, #tpu.memory_space<vmem>>, %arg9: memref<1x1x8xf32, #tpu.memory_space<vmem>>, %arg10: memref<1x8xf32, #tpu.memory_space<vmem>>, %arg11: memref<1x8xf32, #tpu.memory_space<vmem>>, %arg12: memref<1x8xf32, #tpu.memory_space<vmem>>, %arg13: memref<1x8xf32, #tpu.memory_space<vmem>>, %arg14: memref<1x8x32xbf16, #tpu.memory_space<vmem>>, %arg15: memref<1x32xf32, #tpu.memory_space<vmem>>, %arg16: memref<1x8x32xf32, #tpu.memory_space<vmem>>, %arg17: memref<4x8x8xbf16, #tpu.memory_space<vmem>>, %arg18: memref<4x8x8xbf16, #tpu.memory_space<vmem>>, %arg19: memref<8x32xf32, #tpu.memory_space<vmem>>) attributes {dimension_semantics = [#tpu.dimension_semantics<parallel>, #tpu.dimension_semantics<arbitrary>, #tpu.dimension_semantics<arbitrary>], iteration_bounds = array<i64: 2, 1, 4>, scalar_prefetch = 0 : i64, scratch_operands = 3 : i64, tpu.core_type = #tpu.core_type<tc>, window_params = [{transform_indices = @transform_0, window_bounds = array<i64: 1, 8, 32>}, {transform_indices = @transform_1, window_bounds = array<i64: 1, 32, 8>}, {transform_indices = @transform_2, window_bounds = array<i64: 1, 1, 8>}, {transform_indices = @transform_3, window_bounds = array<i64: 1, 32, 8>}, {transform_indices = @transform_4, window_bounds = array<i64: 1, 1, 8>}, {transform_indices = @transform_5, window_bounds = array<i64: 1, 32, 8>}, {transform_indices = @transform_6, window_bounds = array<i64: 1, 1, 8>}, {pipeline_mode = #tpu.pipeline_mode<synchronous>, transform_indices = @transform_7, window_bounds = array<i64: 1, 8>}, {pipeline_mode = #tpu.pipeline_mode<synchronous>, transform_indices = @transform_8, window_bounds = array<i64: 1, 8>}, {pipeline_mode = #tpu.pipeline_mode<synchronous>, transform_indices = @transform_9, window_bounds = array<i64: 1, 8>}, {pipeline_mode = #tpu.pipeline_mode<synchronous>, transform_indices = @transform_10, window_bounds = array<i64: 1, 8>}, {transform_indices = @transform_11, window_bounds = array<i64: 1, 8, 32>}, {pipeline_mode = #tpu.pipeline_mode<synchronous>, transform_indices = @transform_12, window_bounds = array<i64: 1, 32>}, {transform_indices = @transform_13, window_bounds = array<i64: 1, 8, 32>}]} {
    %c0_i32 = arith.constant 0 : i32
    %0 = arith.cmpi eq, %arg2, %c0_i32 : i32
    %1 = arith.extui %0 : i1 to i32
    %c0_i32_0 = arith.constant 0 : i32
    %2 = arith.cmpi ne, %1, %c0_i32_0 : i32
    scf.if %2 {
      %cst_36 = arith.constant 0.000000e+00 : f32
      %73 = vector.broadcast %cst_36 : f32 to vector<8x32xf32>
      %c0_37 = arith.constant 0 : index
      %c0_38 = arith.constant 0 : index
      %74 = vector.load %arg19[%c0_37, %c0_38] : memref<8x32xf32, #tpu.memory_space<vmem>>, vector<8x32xf32>
      tpu.vector_store %arg19[%c0_37, %c0_38], %73 {strides = array<i32>} : memref<8x32xf32, #tpu.memory_space<vmem>>, vector<8x32xf32>,
    } else {
    }
    %c0_i32_1 = arith.constant 0 : i32
    %3 = arith.cmpi eq, %arg1, %c0_i32_1 : i32
    %4 = arith.extui %3 : i1 to i32
    %c0_i32_2 = arith.constant 0 : i32
    %5 = arith.cmpi ne, %4, %c0_i32_2 : i32
    scf.if %5 {
      %c0_36 = arith.constant 0 : index
      %c0_37 = arith.constant 0 : index
      %c0_38 = arith.constant 0 : index
      %73 = vector.load %arg3[%c0_36, %c0_37, %c0_38] : memref<1x8x32xf32, #tpu.memory_space<vmem>>, vector<1x8x32xf32>
      %74 = vector.shape_cast %73 : vector<1x8x32xf32> to vector<8x32xf32>
      %75 = arith.truncf %74 : vector<8x32xf32> to vector<8x32xbf16>
      %c0_39 = arith.constant 0 : index
      %c0_40 = arith.constant 0 : index
      %c0_41 = arith.constant 0 : index
      %76 = vector.load %arg6[%c0_39, %c0_40, %c0_41] : memref<1x32x8xbf16, #tpu.memory_space<vmem>>, vector<1x32x8xbf16>
      %77 = vector.shape_cast %76 : vector<1x32x8xbf16> to vector<32x8xbf16>
      %cst_42 = arith.constant dense<0.000000e+00> : vector<8x8xf32>
      %78 = tpu.matmul %75, %77, %cst_42 {dimension_numbers = #tpu.dot_dimension_numbers<[1], [0], [0], [1], [0, 0, 1, 1], [], []>} : vector<8x32xbf16>, vector<32x8xbf16>, vector<8x8xf32> -> vector<8x8xf32>
      %c0_43 = arith.constant 0 : index
      %c0_44 = arith.constant 0 : index
      %c0_45 = arith.constant 0 : index
      %79 = vector.load %arg7[%c0_43, %c0_44, %c0_45] : memref<1x1x8xf32, #tpu.memory_space<vmem>>, vector<1x1x8xf32>
      %80 = vector.shape_cast %79 : vector<1x1x8xf32> to vector<1x8xf32>
      %81 = vector.broadcast %80 : vector<1x8xf32> to vector<8x8xf32>
      %82 = arith.addf %78, %81 : vector<8x8xf32>
      %c0_46 = arith.constant 0 : index
      %c0_47 = arith.constant 0 : index
      %83 = vector.load %arg12[%c0_46, %c0_47] : memref<1x8xf32, #tpu.memory_space<vmem>>, vector<1x8xf32>
      %c0_48 = arith.constant 0 : index
      %c0_49 = arith.constant 0 : index
      %84 = vector.load %arg13[%c0_48, %c0_49] : memref<1x8xf32, #tpu.memory_space<vmem>>, vector<1x8xf32>
      %cst_50 = arith.constant dense<0.000000e+00> : vector<8xf32>
      %85 = vector.multi_reduction <add>, %82, %cst_50 [1] : vector<8x8xf32> to vector<8xf32>
      %86 = vector.shape_cast %85 : vector<8xf32> to vector<8x1xf32>
      %cst_51 = arith.constant 8.000000e+00 : f32
      %87 = vector.broadcast %cst_51 : f32 to vector<8x1xf32>
      %88 = arith.divf %86, %87 : vector<8x1xf32>
      %89 = vector.broadcast %88 : vector<8x1xf32> to vector<8x8xf32>
      %90 = arith.subf %82, %89 : vector<8x8xf32>
      %91 = arith.mulf %90, %90 : vector<8x8xf32>
      %cst_52 = arith.constant dense<0.000000e+00> : vector<8xf32>
      %92 = vector.multi_reduction <add>, %91, %cst_52 [1] : vector<8x8xf32> to vector<8xf32>
      %93 = vector.shape_cast %92 : vector<8xf32> to vector<8x1xf32>
      %cst_53 = arith.constant 8.000000e+00 : f32
      %94 = vector.broadcast %cst_53 : f32 to vector<8x1xf32>
      %95 = arith.divf %93, %94 : vector<8x1xf32>
      %96 = vector.broadcast %88 : vector<8x1xf32> to vector<8x8xf32>
      %97 = arith.subf %82, %96 : vector<8x8xf32>
      %cst_54 = arith.constant 9.99999974E-6 : f32
      %98 = vector.broadcast %cst_54 : f32 to vector<8x1xf32>
      %99 = arith.addf %95, %98 : vector<8x1xf32>
      %100 = math.rsqrt %99 : vector<8x1xf32>
      %101 = vector.broadcast %100 : vector<8x1xf32> to vector<8x8xf32>
      %102 = arith.mulf %97, %101 : vector<8x8xf32>
      %103 = vector.broadcast %83 : vector<1x8xf32> to vector<8x8xf32>
      %104 = arith.mulf %102, %103 : vector<8x8xf32>
      %105 = vector.broadcast %84 : vector<1x8xf32> to vector<8x8xf32>
      %106 = arith.addf %104, %105 : vector<8x8xf32>
      %c0_55 = arith.constant 0 : index
      %c0_56 = arith.constant 0 : index
      %c0_57 = arith.constant 0 : index
      %107 = vector.load %arg8[%c0_55, %c0_56, %c0_57] : memref<1x32x8xbf16, #tpu.memory_space<vmem>>, vector<1x32x8xbf16>
      %108 = vector.shape_cast %107 : vector<1x32x8xbf16> to vector<32x8xbf16>
      %cst_58 = arith.constant dense<0.000000e+00> : vector<8x8xf32>
      %109 = tpu.matmul %75, %108, %cst_58 {dimension_numbers = #tpu.dot_dimension_numbers<[1], [0], [0], [1], [0, 0, 1, 1], [], []>} : vector<8x32xbf16>, vector<32x8xbf16>, vector<8x8xf32> -> vector<8x8xf32>
      %c0_59 = arith.constant 0 : index
      %c0_60 = arith.constant 0 : index
      %c0_61 = arith.constant 0 : index
      %110 = vector.load %arg9[%c0_59, %c0_60, %c0_61] : memref<1x1x8xf32, #tpu.memory_space<vmem>>, vector<1x1x8xf32>
      %111 = vector.shape_cast %110 : vector<1x1x8xf32> to vector<1x8xf32>
      %112 = vector.broadcast %111 : vector<1x8xf32> to vector<8x8xf32>
      %113 = arith.addf %109, %112 : vector<8x8xf32>
      %114 = arith.truncf %106 : vector<8x8xf32> to vector<8x8xbf16>
      %115 = arith.index_cast %arg2 : i32 to index
      %c0_62 = arith.constant 0 : index
      %c0_63 = arith.constant 0 : index
      %116 = vector.load %arg17[%115, %c0_62, %c0_63] : memref<4x8x8xbf16, #tpu.memory_space<vmem>>, vector<1x8x8xbf16>
      %117 = vector.shape_cast %116 : vector<1x8x8xbf16> to vector<8x8xbf16>
      %118 = vector.shape_cast %114 : vector<8x8xbf16> to vector<1x8x8xbf16>
      tpu.vector_store %arg17[%115, %c0_62, %c0_63], %118 {strides = array<i32>} : memref<4x8x8xbf16, #tpu.memory_space<vmem>>, vector<1x8x8xbf16>,
      %119 = arith.truncf %113 : vector<8x8xf32> to vector<8x8xbf16>
      %120 = arith.index_cast %arg2 : i32 to index
      %c0_64 = arith.constant 0 : index
      %c0_65 = arith.constant 0 : index
      %121 = vector.load %arg18[%120, %c0_64, %c0_65] : memref<4x8x8xbf16, #tpu.memory_space<vmem>>, vector<1x8x8xbf16>
      %122 = vector.shape_cast %121 : vector<1x8x8xbf16> to vector<8x8xbf16>
      %123 = vector.shape_cast %119 : vector<8x8xbf16> to vector<1x8x8xbf16>
      tpu.vector_store %arg18[%120, %c0_64, %c0_65], %123 {strides = array<i32>} : memref<4x8x8xbf16, #tpu.memory_space<vmem>>, vector<1x8x8xbf16>,
    } else {
    }
    %c8_i32 = arith.constant 8 : i32
    %6 = arith.muli %arg1, %c8_i32 : i32
    %7 = tpu.assume_multiple %6, 8 : i32
    %c0 = arith.constant 0 : index
    %8 = arith.index_cast %7 : i32 to index
    %c0_3 = arith.constant 0 : index
    %9 = vector.load %arg3[%c0, %8, %c0_3] : memref<1x8x32xf32, #tpu.memory_space<vmem>>, vector<1x8x32xf32>
    %10 = vector.shape_cast %9 : vector<1x8x32xf32> to vector<8x32xf32>
    %11 = arith.truncf %10 : vector<8x32xf32> to vector<8x32xbf16>
    %c0_4 = arith.constant 0 : index
    %c0_5 = arith.constant 0 : index
    %c0_6 = arith.constant 0 : index
    %12 = vector.load %arg4[%c0_4, %c0_5, %c0_6] : memref<1x32x8xbf16, #tpu.memory_space<vmem>>, vector<1x32x8xbf16>
    %13 = vector.shape_cast %12 : vector<1x32x8xbf16> to vector<32x8xbf16>
    %cst = arith.constant dense<0.000000e+00> : vector<8x8xf32>
    %14 = tpu.matmul %11, %13, %cst {dimension_numbers = #tpu.dot_dimension_numbers<[1], [0], [0], [1], [0, 0, 1, 1], [], []>} : vector<8x32xbf16>, vector<32x8xbf16>, vector<8x8xf32> -> vector<8x8xf32>
    %c0_7 = arith.constant 0 : index
    %c0_8 = arith.constant 0 : index
    %c0_9 = arith.constant 0 : index
    %15 = vector.load %arg5[%c0_7, %c0_8, %c0_9] : memref<1x1x8xf32, #tpu.memory_space<vmem>>, vector<1x1x8xf32>
    %16 = vector.shape_cast %15 : vector<1x1x8xf32> to vector<1x8xf32>
    %17 = vector.broadcast %16 : vector<1x8xf32> to vector<8x8xf32>
    %18 = arith.addf %14, %17 : vector<8x8xf32>
    %c0_10 = arith.constant 0 : index
    %c0_11 = arith.constant 0 : index
    %19 = vector.load %arg10[%c0_10, %c0_11] : memref<1x8xf32, #tpu.memory_space<vmem>>, vector<1x8xf32>
    %c0_12 = arith.constant 0 : index
    %c0_13 = arith.constant 0 : index
    %20 = vector.load %arg11[%c0_12, %c0_13] : memref<1x8xf32, #tpu.memory_space<vmem>>, vector<1x8xf32>
    %cst_14 = arith.constant dense<0.000000e+00> : vector<8xf32>
    %21 = vector.multi_reduction <add>, %18, %cst_14 [1] : vector<8x8xf32> to vector<8xf32>
    %22 = vector.shape_cast %21 : vector<8xf32> to vector<8x1xf32>
    %cst_15 = arith.constant 8.000000e+00 : f32
    %23 = vector.broadcast %cst_15 : f32 to vector<8x1xf32>
    %24 = arith.divf %22, %23 : vector<8x1xf32>
    %25 = vector.broadcast %24 : vector<8x1xf32> to vector<8x8xf32>
    %26 = arith.subf %18, %25 : vector<8x8xf32>
    %27 = arith.mulf %26, %26 : vector<8x8xf32>
    %cst_16 = arith.constant dense<0.000000e+00> : vector<8xf32>
    %28 = vector.multi_reduction <add>, %27, %cst_16 [1] : vector<8x8xf32> to vector<8xf32>
    %29 = vector.shape_cast %28 : vector<8xf32> to vector<8x1xf32>
    %cst_17 = arith.constant 8.000000e+00 : f32
    %30 = vector.broadcast %cst_17 : f32 to vector<8x1xf32>
    %31 = arith.divf %29, %30 : vector<8x1xf32>
    %32 = vector.broadcast %24 : vector<8x1xf32> to vector<8x8xf32>
    %33 = arith.subf %18, %32 : vector<8x8xf32>
    %cst_18 = arith.constant 9.99999974E-6 : f32
    %34 = vector.broadcast %cst_18 : f32 to vector<8x1xf32>
    %35 = arith.addf %31, %34 : vector<8x1xf32>
    %36 = math.rsqrt %35 : vector<8x1xf32>
    %37 = vector.broadcast %36 : vector<8x1xf32> to vector<8x8xf32>
    %38 = arith.mulf %33, %37 : vector<8x8xf32>
    %39 = vector.broadcast %19 : vector<1x8xf32> to vector<8x8xf32>
    %40 = arith.mulf %38, %39 : vector<8x8xf32>
    %41 = vector.broadcast %20 : vector<1x8xf32> to vector<8x8xf32>
    %42 = arith.addf %40, %41 : vector<8x8xf32>
    %43 = arith.index_cast %arg2 : i32 to index
    %c0_19 = arith.constant 0 : index
    %c0_20 = arith.constant 0 : index
    %44 = vector.load %arg17[%43, %c0_19, %c0_20] : memref<4x8x8xbf16, #tpu.memory_space<vmem>>, vector<1x8x8xbf16>
    %45 = vector.shape_cast %44 : vector<1x8x8xbf16> to vector<8x8xbf16>
    %46 = arith.index_cast %arg2 : i32 to index
    %c0_21 = arith.constant 0 : index
    %c0_22 = arith.constant 0 : index
    %47 = vector.load %arg18[%46, %c0_21, %c0_22] : memref<4x8x8xbf16, #tpu.memory_space<vmem>>, vector<1x8x8xbf16>
    %48 = vector.shape_cast %47 : vector<1x8x8xbf16> to vector<8x8xbf16>
    %49 = arith.truncf %42 : vector<8x8xf32> to vector<8x8xbf16>
    %cst_23 = arith.constant dense<0.000000e+00> : vector<8x8xf32>
    %50 = tpu.matmul %49, %45, %cst_23 {dimension_numbers = #tpu.dot_dimension_numbers<[1], [1], [0], [0], [0, 0, 1, 0], [], []>} : vector<8x8xbf16>, vector<8x8xbf16>, vector<8x8xf32> -> vector<8x8xf32>
    %cst_24 = arith.constant dense<0xFF800000> : vector<8xf32>
    %51 = vector.multi_reduction <maximumf>, %50, %cst_24 [1] : vector<8x8xf32> to vector<8xf32>
    %52 = vector.shape_cast %51 : vector<8xf32> to vector<8x1xf32>
    %53 = vector.broadcast %52 : vector<8x1xf32> to vector<8x8xf32>
    %54 = arith.subf %50, %53 : vector<8x8xf32>
    %55 = math.exp %54 : vector<8x8xf32>
    %cst_25 = arith.constant dense<0.000000e+00> : vector<8xf32>
    %56 = vector.multi_reduction <add>, %55, %cst_25 [1] : vector<8x8xf32> to vector<8xf32>
    %57 = vector.shape_cast %56 : vector<8xf32> to vector<8x1xf32>
    %58 = tpu.reciprocal %57 {approx = true} : vector<8x1xf32> -> vector<8x1xf32>
    %59 = vector.broadcast %58 : vector<8x1xf32> to vector<8x8xf32>
    %60 = arith.mulf %55, %59 : vector<8x8xf32>
    %61 = arith.truncf %60 : vector<8x8xf32> to vector<8x8xbf16>
    %cst_26 = arith.constant dense<0.000000e+00> : vector<8x8xf32>
    %62 = tpu.matmul %61, %48, %cst_26 {dimension_numbers = #tpu.dot_dimension_numbers<[1], [0], [0], [1], [0, 0, 1, 1], [], []>} : vector<8x8xbf16>, vector<8x8xbf16>, vector<8x8xf32> -> vector<8x8xf32>
    %c0_27 = arith.constant 0 : index
    %c0_28 = arith.constant 0 : index
    %63 = vector.load %arg19[%c0_27, %c0_28] : memref<8x32xf32, #tpu.memory_space<vmem>>, vector<8x32xf32>
    %64 = arith.truncf %62 : vector<8x8xf32> to vector<8x8xbf16>
    %c0_29 = arith.constant 0 : index
    %c0_30 = arith.constant 0 : index
    %c0_31 = arith.constant 0 : index
    %65 = vector.load %arg14[%c0_29, %c0_30, %c0_31] : memref<1x8x32xbf16, #tpu.memory_space<vmem>>, vector<1x8x32xbf16>
    %66 = vector.shape_cast %65 : vector<1x8x32xbf16> to vector<8x32xbf16>
    %cst_32 = arith.constant dense<0.000000e+00> : vector<8x32xf32>
    %67 = tpu.matmul %64, %66, %cst_32 {dimension_numbers = #tpu.dot_dimension_numbers<[1], [0], [0], [1], [0, 0, 1, 1], [], []>} : vector<8x8xbf16>, vector<8x32xbf16>, vector<8x32xf32> -> vector<8x32xf32>
    %68 = arith.addf %63, %67 : vector<8x32xf32>
    %c0_33 = arith.constant 0 : index
    %c0_34 = arith.constant 0 : index
    %69 = vector.load %arg19[%c0_33, %c0_34] : memref<8x32xf32, #tpu.memory_space<vmem>>, vector<8x32xf32>
    tpu.vector_store %arg19[%c0_33, %c0_34], %68 {strides = array<i32>} : memref<8x32xf32, #tpu.memory_space<vmem>>, vector<8x32xf32>,
    %c3_i32 = arith.constant 3 : i32
    %70 = arith.cmpi eq, %arg2, %c3_i32 : i32
    %71 = arith.extui %70 : i1 to i32
    %c0_i32_35 = arith.constant 0 : i32
    %72 = arith.cmpi ne, %71, %c0_i32_35 : i32
    scf.if %72 {
      %c0_36 = arith.constant 0 : index
      %c0_37 = arith.constant 0 : index
      %73 = vector.load %arg19[%c0_36, %c0_37] : memref<8x32xf32, #tpu.memory_space<vmem>>, vector<8x32xf32>
      %c0_38 = arith.constant 0 : index
      %c0_39 = arith.constant 0 : index
      %74 = vector.load %arg15[%c0_38, %c0_39] : memref<1x32xf32, #tpu.memory_space<vmem>>, vector<1x32xf32>
      %75 = vector.broadcast %74 : vector<1x32xf32> to vector<8x32xf32>
      %76 = arith.addf %73, %75 : vector<8x32xf32>
      %c0_40 = arith.constant 0 : index
      %c0_41 = arith.constant 0 : index
      %c0_42 = arith.constant 0 : index
      %77 = vector.load %arg16[%c0_40, %c0_41, %c0_42] : memref<1x8x32xf32, #tpu.memory_space<vmem>>, vector<1x8x32xf32>
      %78 = vector.shape_cast %77 : vector<1x8x32xf32> to vector<8x32xf32>
      %79 = vector.shape_cast %76 : vector<8x32xf32> to vector<1x8x32xf32>
      tpu.vector_store %arg16[%c0_40, %c0_41, %c0_42], %79 {strides = array<i32>} : memref<1x8x32xf32, #tpu.memory_space<vmem>>, vector<1x8x32xf32>,
    } else {
    }
    return
  }
  func.func @transform_0(%arg0: i32, %arg1: i32, %arg2: i32) -> (i32, i32, i32) {
    %c0_i32 = arith.constant 0 : i32
    %c0_i32_0 = arith.constant 0 : i32
    %c0_i32_1 = arith.constant 0 : i32
    return %arg0, %c0_i32, %c0_i32_0 : i32, i32, i32
  }
  func.func @transform_1(%arg0: i32, %arg1: i32, %arg2: i32) -> (i32, i32, i32) {
    %c0_i32 = arith.constant 0 : i32
    %c0_i32_0 = arith.constant 0 : i32
    %c0_i32_1 = arith.constant 0 : i32
    return %arg2, %c0_i32, %c0_i32_0 : i32, i32, i32
  }
  func.func @transform_2(%arg0: i32, %arg1: i32, %arg2: i32) -> (i32, i32, i32) {
    %c0_i32 = arith.constant 0 : i32
    %c0_i32_0 = arith.constant 0 : i32
    %c0_i32_1 = arith.constant 0 : i32
    return %arg2, %c0_i32, %c0_i32_0 : i32, i32, i32
  }
  func.func @transform_3(%arg0: i32, %arg1: i32, %arg2: i32) -> (i32, i32, i32) {
    %c0_i32 = arith.constant 0 : i32
    %c0_i32_0 = arith.constant 0 : i32
    %c0_i32_1 = arith.constant 0 : i32
    return %arg2, %c0_i32, %c0_i32_0 : i32, i32, i32
  }
  func.func @transform_4(%arg0: i32, %arg1: i32, %arg2: i32) -> (i32, i32, i32) {
    %c0_i32 = arith.constant 0 : i32
    %c0_i32_0 = arith.constant 0 : i32
    %c0_i32_1 = arith.constant 0 : i32
    return %arg2, %c0_i32, %c0_i32_0 : i32, i32, i32
  }
  func.func @transform_5(%arg0: i32, %arg1: i32, %arg2: i32) -> (i32, i32, i32) {
    %c0_i32 = arith.constant 0 : i32
    %c0_i32_0 = arith.constant 0 : i32
    %c0_i32_1 = arith.constant 0 : i32
    return %arg2, %c0_i32, %c0_i32_0 : i32, i32, i32
  }
  func.func @transform_6(%arg0: i32, %arg1: i32, %arg2: i32) -> (i32, i32, i32) {
    %c0_i32 = arith.constant 0 : i32
    %c0_i32_0 = arith.constant 0 : i32
    %c0_i32_1 = arith.constant 0 : i32
    return %arg2, %c0_i32, %c0_i32_0 : i32, i32, i32
  }
  func.func @transform_7(%arg0: i32, %arg1: i32, %arg2: i32) -> (i32, i32) {
    %c0_i32 = arith.constant 0 : i32
    %c0_i32_0 = arith.constant 0 : i32
    %c0_i32_1 = arith.constant 0 : i32
    return %c0_i32, %c0_i32_0 : i32, i32
  }
  func.func @transform_8(%arg0: i32, %arg1: i32, %arg2: i32) -> (i32, i32) {
    %c0_i32 = arith.constant 0 : i32
    %c0_i32_0 = arith.constant 0 : i32
    %c0_i32_1 = arith.constant 0 : i32
    return %c0_i32, %c0_i32_0 : i32, i32
  }
  func.func @transform_9(%arg0: i32, %arg1: i32, %arg2: i32) -> (i32, i32) {
    %c0_i32 = arith.constant 0 : i32
    %c0_i32_0 = arith.constant 0 : i32
    %c0_i32_1 = arith.constant 0 : i32
    return %c0_i32, %c0_i32_0 : i32, i32
  }
  func.func @transform_10(%arg0: i32, %arg1: i32, %arg2: i32) -> (i32, i32) {
    %c0_i32 = arith.constant 0 : i32
    %c0_i32_0 = arith.constant 0 : i32
    %c0_i32_1 = arith.constant 0 : i32
    return %c0_i32, %c0_i32_0 : i32, i32
  }
  func.func @transform_11(%arg0: i32, %arg1: i32, %arg2: i32) -> (i32, i32, i32) {
    %c0_i32 = arith.constant 0 : i32
    %c0_i32_0 = arith.constant 0 : i32
    %c0_i32_1 = arith.constant 0 : i32
    return %arg2, %c0_i32, %c0_i32_0 : i32, i32, i32
  }
  func.func @transform_12(%arg0: i32, %arg1: i32, %arg2: i32) -> (i32, i32) {
    %c0_i32 = arith.constant 0 : i32
    %c0_i32_0 = arith.constant 0 : i32
    %c0_i32_1 = arith.constant 0 : i32
    return %c0_i32, %c0_i32_0 : i32, i32
  }
  func.func @transform_13(%arg0: i32, %arg1: i32, %arg2: i32) -> (i32, i32, i32) {
    %c0_i32 = arith.constant 0 : i32
    %c0_i32_0 = arith.constant 0 : i32
    return %arg0, %arg1, %c0_i32 : i32, i32, i32
  }
}

</mosaic_0001>

<bundles_post_ra>
// kernel: tpu_custom_call.1
= control target key start
LH: loop header
LB: loop body
LE: loop exit
PB: predicated region body
PF: predicated region fallthrough
CT: control target
= control target key end

     0   :  { %s1599_s0 = inlined_call_operand.vmem [shape: f32[2,8,32], index: 0, kind: input, shape index: {}]   ;;  %s1600_s1 = inlined_call_operand.vmem [shape: bf16[4,32,8], index: 1, kind: input, shape index: {}]   ;;  %s1601_s2 = inlined_call_operand.vmem [shape: f32[4,1,8], index: 2, kind: input, shape index: {}]   ;;  %s1602_s3 = inlined_call_operand.vmem [shape: bf16[4,32,8], index: 3, kind: input, shape index: {}]   ;;  %s1603_s4 = inlined_call_operand.vmem [shape: f32[4,1,8], index: 4, kind: input, shape index: {}]   ;;  %s1604_s5 = inlined_call_operand.vmem [shape: bf16[4,32,8], index: 5, kind: input, shape index: {}]   ;;  %s1605_s6 = inlined_call_operand.vmem [shape: f32[4,1,8], index: 6, kind: input, shape index: {}]   ;;  %s1606_s7 = inlined_call_operand.vmem [shape: f32[1,8], index: 7, kind: input, shape index: {}]   ;;  %s1607_s8 = inlined_call_operand.vmem [shape: f32[1,8], index: 8, kind: input, shape index: {}]   ;;  %s1608_s9 = inlined_call_operand.vmem [shape: f32[1,8], index: 9, kind: input, shape index: {}]   ;;  %s1609_s10 = inlined_call_operand.vmem [shape: f32[1,8], index: 10, kind: input, shape index: {}]   ;;  %s1610_s11 = inlined_call_operand.vmem [shape: bf16[4,8,32], index: 11, kind: input, shape index: {}]   ;;  %s1611_s12 = inlined_call_operand.vmem [shape: f32[1,32], index: 12, kind: input, shape index: {}]   ;;  %s1612_s13 = inlined_call_operand.hbm [shape: f32[2,8,32], index: 13, kind: output, shape index: {}]  }
   0x1   :  { %1627 = sst [smem:[#allocation20_spill]] %s1599_s0 }
   0x2   :  { %1628 = sst [smem:[#allocation21_spill]] %s1606_s7 }
   0x3   :  { %1629 = sst [smem:[#allocation22_spill]] %s1607_s8 }
   0x4   :  { %1630 = sst [smem:[#allocation23_spill]] %s1611_s12 }
   0x5   :  { %1631 = sst [smem:[#allocation24_spill]] %s1612_s13 }
   0x6   :  { %18 = vsyncpa [#allocation6], 0 }
   0x7   :  { %20 = vsyncpa [#allocation6 + $0x1], 0  ;;  %s1380_s25 = smov 0   ;;  %s1382_s26 = smov 0  }
   0x8   :  { %s1384_s27 = smov 0   ;;  %s1386_s28 = smov 0  }
   0x9   :  { %s1388_s29 = smov 0   ;;  %s1390_s30 = smov 0  }
   0xa   :  { %s1392_s14 = smov 0   ;;  %s1394_s15 = smov 0  }
   0xb LB: > { %1632 = sst [smem:[#allocation8_spill]] %s1278_s25  ;;  %s1058_s16 = sadd.s32 4294967295, %s1306_s15   ;;  %s1306_s15 = sphi %s1394_s15, %s26_s15   ;;  %s1302_s14 = sphi %s1392_s14, %s1666_s14   ;;  %s1298_s30 = sphi %s1390_s30, %s1665_s30   ;;  %s1294_s29 = sphi %s1388_s29, %s1664_s29   ;;  %s1290_s28 = sphi %s1386_s28, %s1663_s28   ;;  %s1286_s27 = sphi %s1384_s27, %s1662_s27   ;;  %s1282_s26 = sphi %s1382_s26, %s1661_s26   ;;  %s1278_s25 = sphi %s1380_s25, %s1660_s25  }
   0xc   : > { %1633 = sst [smem:[#allocation9_spill]] %s1282_s26  ;;  %s1059_s17 = sadd.s32 4294967294, %s1306_s15  }
   0xd   : > { %1634 = sst [smem:[#allocation10_spill]] %s1286_s27  ;;  %s38_s18 = sadd.s32 1, %s1298_s30 }
   0xe   : > { %1635 = sst [smem:[#allocation11_spill]] %s1294_s29  ;;  %p39_p0 = scmp.ge.s32.totalorder %s38_s18, 4 }
   0xf   : > { %1636 = sst [smem:[#allocation12_spill]] %s1298_s30  ;;  %s45_s19 = sadd.s32 1, %s1302_s14 }
  0x10   : > { %1637 = sst [smem:[#allocation13_spill]] %s1302_s14  ;;  %p377_p1 = scmp.ne.s32.totalorder %s1286_s27, %s1282_s26 }
  0x11   : > { %1638 = sst [smem:[#allocation14_spill]] %s1306_s15  ;;  %p378_p2 = scmp.eq.s32.totalorder %s1058_s16, 7 }
  0x12   : > { %s1668_s18 = smov (%p39_p0, %s38_s18), 0  ;;  %s1670_s19 = smov (!%p39_p0, %s45_s19), %s1302_s14 }
  0x13   : > { %1639 = sst [smem:[#allocation15_spill]] %s1668_s18  ;;  %p1429_p3 = por %p378_p2, %p377_p1 }
  0x14   : > { %p383_p4 = scmp.ne.s32.totalorder %s1282_s26, %s1278_s25  ;;  %p47_p5 = scmp.ge.s32.totalorder %s1670_s19, 2 }
  0x15   : > { %s1640_s20 = scalar_select %p1429_p3, 1, 0 }
  0x16   : > { %p384_p6 = scmp.eq.s32.totalorder %s1059_s17, 7  ;;  %p1062_p7 = scmp.ge.s32.totalorder %s1306_s15, 1 }
  0x17   : > { %1641 = sst [smem:[#allocation16_spill]] %s1640_s20  ;;  %p473_p8 = scmp.lt.s32.totalorder %s1306_s15, 9 }
  0x18   : > { %s1672_s19 = smov (%p47_p5, %s1670_s19), 0  ;;  %p1439_p9 = por %p384_p6, %p383_p4 }
  0x19   : > { %1642 = sst [smem:[#allocation17_spill]] %s1672_s19  ;;  %p474_p10 = pnand %p1062_p7, %p473_p8 }
  0x1a   : > { %s1643_s21 = scalar_select %p1439_p9, 1, 0 }
  0x1b   : > { %s362_s22 = ssub.s32 %s1302_s14, %s1672_s19  ;;  %s367_s23 = sadd.s32 1, %s1286_s27 }
  0x1c   : > { %1644 = sst [smem:[#allocation18_spill]] %s1643_s21  ;;  %p365_p11 = scmp.eq.s32.totalorder %s362_s22, 0 }
  0x1d   : > { %477 = sbr.rel (%p474_p10) target bundleno = 1147 (0x47b), region = 72  ;;  %s1618_s16 = sand.u32 (!%p474_p10), 1, %s1282_s26  }
  0x1e   : > { %s1447_s24 = scalar_select %p365_p11, %s1286_s27, %s367_s23  }
  0x1f   : > { %p544_p12 = scmp.lt.s32.totalorder (!%p474_p10), %s1294_s29, 1  ;;  %s1453_s17 = sshll.u32 (!%p474_p10), %s1618_s16, 3 }
  0x20   : > { %1645 = sst [smem:[#allocation19_spill]] %s1447_s24  ;;  %p548_p13 = scmp.lt.s32.totalorder (!%p474_p10), %s1290_s28, 3 }
  0x21   : > { %s1646_s0 = sld [smem:[#allocation20_spill]] (!%p474_p10)  ;;  %s543_s26 = scalar_lea.vmem (!%p474_p10), [#allocation5], %s1453_s17 }
  0x22   : > { %s545_s18 = scalar_select %p544_p12, %s1294_s29, 1 }
  0x23   : > { %s1458_s19 = scalar_select %p548_p13, %s1290_s28, 3 }
  0x24   : > { %s1064_s22 = sshll.u32 %s545_s18, 3  ;;  %p1072_p0 = scmp.ne.s32.totalorder %s1290_s28, 0 }
  0x25   : > { %s1112_s24 = sshll.u32 %s1458_s19, 4  ;;  %s563_s18 = scalar_lea.vmem %s1603_s4, %s1458_s19 }
  0x26   : > { %s552_s16 = scalar_lea.vmem %s1600_s1, %s1112_s24  ;;  %s560_s29 = scalar_lea.vmem %s1602_s3, %s1112_s24 }
  0x27   : > { %s547_s30 = scalar_lea.vmem %s1646_s0, %s1064_s22  ;;  %s1481_s22 = scalar_lea.vmem %s1604_s5, %s1112_s24 }
  0x28   : > { %s571_s21 = scalar_lea.vmem %s1605_s6, %s1458_s19  ;;  %s1071_s0 = sshll.u32 %s1458_s19, 2 }
  0x29   : > { %s1491_s13 = scalar_lea.vmem %s1610_s11, %s1071_s0  ;;  %580 = sbr.rel (%p1072_p0) target bundleno = 48 (0x30), region = 76 }
  0x2e   : > { %vm581_vm0 = vcmask 261120   ;;  %v1308_v0 = vmov 0.0  }
  0x2f   : > { %582 = vst.msk [vmem:[#allocation4] sm:$0xff] %vm581_vm0, %v1308_v0 }
  0x30 PF: > { %v1116_v1 = vld [vmem:[%s560_s29 + $0x8] sm:$0xff]  ;;  %v1115_v3 = vld [vmem:[%s560_s29] sm:$0xff]  ;;  %vm609_vm1 = vcmask 261120   ;;  %vm628_vm2 = vcmask 64512   ;;  %s1647_s8 = scalar_lea.vmem %s1601_s2, %s1458_s19  ;;  %v1309_v17 = vmov 8.0   ;;  %s1091_s24 = sshll.u32 %s1290_s28, 2 }
  0x31   : > { %v1120_v2 = vld [vmem:[%s552_s16 + $0x8] sm:$0xff]  ;;  %v1119_v4 = vld [vmem:[%s552_s16] sm:$0xff]  ;;  %619 = vmatpush.bf16.msra.mxu0 %v1116_v1  ;;  %1201 = vrcp.f32 %v1309_v17  ;;  %vm702_vm9 = vcmask 60416   ;;  %s701_s16 = scalar_lea.vmem [#allocation2], %s1091_s24  ;;  %s1648_s23 = sld [smem:[#allocation21_spill]]  ;;  %vm830_vm11 = vcmask 1043456  }
  0x32   : > { %742 = vmatpush.bf16.msra.mxu2 %v1120_v2  ;;  %v587_v5 = vld [vmem:[%s547_s30] sm:$0xff]  ;;  %s1649_s15 = sld [smem:[#allocation22_spill]]  ;;  %p1107_p1 = scmp.ne.s32.totalorder %s1290_s28, 3 }
  0x33   : > { %v1495_v6 = vpack.c.bf16 %v587_v5, %v587_v5  ;;  %v1194_v7 = vld [vmem:[%s563_s18] ss:$0 sm:$0xff] }
  0x34   : > { %v1195_v11 = vld [vmem:[%s1647_s8] ss:$0 sm:$0xff] }
  0x35   : > { %620 = vmatpush.bf16.msra.mxu0 %v1115_v3  ;;  %v1196_v48 = vld [vmem:[%s1608_s9] ss:$0 sm:$0xff] }
  0x36   : > { %743 = vmatpush.bf16.msra.mxu2 %v1119_v4  ;;  %v1197_v52 = vld [vmem:[%s1609_s10] ss:$0 sm:$0xff]  ;;  %v1118_v4 = vld [vmem:[%s1481_s22 + $0x8] sm:$0xff] }
  0x37   : > { %v1202_v18 = vpop.eup %1201  ;;  %v1198_v61 = vld [vmem:[%s1648_s23] ss:$0 sm:$0xff]  ;;  %692 = vmatpush.bf16.msra.mxu1 %v1118_v4 }
  0x38   : > { %1081 = vmatmul.msk.bf16.vlgmr.msra.gmra.mxu0 %vm609_vm1, %v1495_v6  ;;  %v633_v19 = vmul.f32 8.0, %v1202_v18  ;;  %vm637_vm3 = vweird.f32 %v1202_v18  ;;  %v1199_v63 = vld [vmem:[%s1649_s15] ss:$0 sm:$0xff] }
  0x39   : > { %1101 = vmatmul.msk.bf16.vlgmr.msra.gmra.mxu2 %vm609_vm1, %v1495_v6  ;;  %v1117_v5 = vld [vmem:[%s1481_s22] sm:$0xff]  ;;  %s706_s22 = scalar_lea.vmem [#allocation3], %s1091_s24 }
  0x3a   : > { %v634_v20 = vsub.f32 1.0, %v633_v19 }
  0x3b   : > { %693 = vmatpush.bf16.msra.mxu1 %v1117_v5 }
  0x3c   : > { %v635_v21 = vmul.f32 %v1202_v18, %v634_v20 }
  0x3e   : > { %v636_v22 = vadd.f32 %v1202_v18, %v635_v21  ;;  %1090 = vmatmul.msk.bf16.vlgmr.msra.gmra.mxu1 %vm609_vm1, %v1495_v6  ;;  %v849_v21 = vld [vmem:[%s1491_s13] sm:$0xf] }
  0x40   : > { %v638_v23 = vsel %vm637_vm3, %v1202_v18, %v636_v22  ;;  %v854_v22 = vsel %vm830_vm11, %v849_v21, 0 }
  0x41   : > { %863 = vmatpush.bf16.msrb.mxu1 %v854_v22 }
  0xb5   : > { %v622_v8 = vpop.f32.mrf.mxu0 }
  0xb6   : > { %v623_v9 = vadd.f32 %v1194_v7, %v622_v8 }
  0xb8   : > { %v629_v10 = vsel %vm628_vm2, %v623_v9, 0.0 }
  0xb9   : > { %630 = vadd.xlane.f32.xlu0 %v629_v10  ;;  %v1200_v10 = vld [vmem:[%s571_s21] ss:$0 sm:$0xff]  ;;  %s1650_s21 = sld [smem:[#allocation23_spill]] (!%p1107_p1) }
  0xbc   : > { %v745_v12 = vpop.f32.mrf.mxu2 }
  0xbd   : > { %v746_v13 = vadd.f32 %v1195_v11, %v745_v12  ;;  %v624_v14 = vpop.f32.mrf.mxu0  ;;  %v695_v11 = vpop.f32.mrf.mxu1 }
  0xbe   : > { %v696_v12 = vadd.f32 %v1200_v10, %v695_v11 }
  0xbf   : > { %v752_v15 = vsel %vm628_vm2, %v746_v13, 0.0 }
  0xc1   : > { %753 = vadd.xlane.f32.xlu0 %v752_v15 }
  0xc4   : > { %v747_v16 = vpop.f32.mrf.mxu2 }
  0xc5   : > { %v697_v15 = vpop.f32.mrf.mxu1 }
 0x12c   : > { %v631_v24 = vpop.xlane.xlu0 %630 }
 0x12d   : > { %v639_v25 = vmul.f32 %v638_v23, %v631_v24 }
 0x12f   : > { %v640_v26 = vsub.f32 %v623_v9, %v639_v25 }
 0x131   : > { %v641_v27 = vmul.f32 %v640_v26, %v640_v26 }
 0x133   : > { %v642_v28 = vsel %vm628_vm2, %v641_v27, 0.0 }
 0x134   : > { %643 = vadd.xlane.f32.xlu1 %v642_v28  ;;  %v754_v29 = vpop.xlane.xlu0 %753 }
 0x135   : > { %v762_v30 = vmul.f32 %v754_v29, %v638_v23 }
 0x137   : > { %v763_v31 = vsub.f32 %v746_v13, %v762_v30  ;;  %v704_v13 = vpack.c.bf16 %v696_v12, %v696_v12  ;;  %v847_v30 = vld [vmem:[#allocation4] sm:$0xff] }
 0x139   : > { %v764_v32 = vmul.f32 %v763_v31, %v763_v31  ;;  %707 = vst.msk [vmem:[%s706_s22] sm:$0xf] %vm702_vm9, %v704_v13 }
 0x13b   : > { %v765_v33 = vsel %vm628_vm2, %v764_v32, 0.0 }
 0x13c   : > { %766 = vadd.xlane.f32.xlu1 %v765_v33 }
 0x140   : > { %v794_v17 = vld [vmem:[%s706_s22] sm:$0xf] }
 0x141   : > { %v832_v18 = vsel %vm830_vm11, %v794_v17, 0 }
 0x142   : > { %841 = vmatpush.bf16.msrb.mxu0 %v832_v18 }
 0x1a7   : > { %v644_v34 = vpop.xlane.xlu1 %643 }
 0x1a8   : > { %v645_v35 = vmul.f32 %v644_v34, %v638_v23 }
 0x1aa   : > { %v646_v36 = vadd.f32 1e-05, %v645_v35 }
 0x1ac   : > { %1203 = vrsqrt.f32 %v646_v36  ;;  %vm653_vm5 = vweird.f32 %v646_v36 }
 0x1af   : > { %v767_v37 = vpop.xlane.xlu1 %766 }
 0x1b0   : > { %v768_v38 = vmul.f32 %v767_v37, %v638_v23 }
 0x1b2   : > { %v1204_v39 = vpop.eup %1203  ;;  %v769_v40 = vadd.f32 1e-05, %v768_v38 }
 0x1b3   : > { %v648_v41 = vmul.f32 %v1204_v39, %v646_v36  ;;  %vm654_vm4 = vweird.f32 %v1204_v39 }
 0x1b4   : > { %1205 = vrsqrt.f32 %v769_v40  ;;  %vm655_vm6 = vmor %vm653_vm5, %vm654_vm4  ;;  %vm776_vm8 = vweird.f32 %v769_v40 }
 0x1b5   : > { %v649_v42 = vmul.f32 %v1204_v39, %v648_v41 }
 0x1b7   : > { %v650_v43 = vmul.f32 0.5, %v649_v42 }
 0x1b9   : > { %v651_v44 = vsub.f32 1.5, %v650_v43 }
 0x1ba   : > { %v1206_v45 = vpop.eup %1205 }
 0x1bb   : > { %v652_v46 = vmul.f32 %v1204_v39, %v651_v44  ;;  %v771_v47 = vmul.f32 %v1206_v45, %v769_v40  ;;  %vm777_vm7 = vweird.f32 %v1206_v45 }
 0x1bc   : > { %vm778_vm10 = vmor %vm776_vm8, %vm777_vm7 }
 0x1bd   : > { %v656_v49 = vsel %vm655_vm6, %v1204_v39, %v652_v46  ;;  %v772_v50 = vmul.f32 %v1206_v45, %v771_v47 }
 0x1be   : > { %v657_v51 = vmul.f32 %v656_v49, %v640_v26 }
 0x1bf   : > { %v773_v53 = vmul.f32 0.5, %v772_v50 }
 0x1c0   : > { %v661_v54 = vmul.f32 %v1196_v48, %v657_v51 }
 0x1c1   : > { %v774_v55 = vsub.f32 1.5, %v773_v53 }
 0x1c2   : > { %v665_v56 = vadd.f32 %v1197_v52, %v661_v54 }
 0x1c3   : > { %v775_v57 = vmul.f32 %v1206_v45, %v774_v55 }
 0x1c4   : > { %v699_v58 = vpack.c.bf16 %v665_v56, %v665_v56 }
 0x1c5   : > { %v779_v59 = vsel %vm778_vm10, %v1206_v45, %v775_v57 }
 0x1c6   : > { %703 = vst.msk [vmem:[%s701_s16] sm:$0xf] %vm702_vm9, %v699_v58  ;;  %v780_v60 = vmul.f32 %v779_v59, %v763_v31 }
 0x1c8   : > { %v784_v62 = vmul.f32 %v1198_v61, %v780_v60 }
 0x1ca   : > { %v788_v2 = vadd.f32 %v1199_v63, %v784_v62 }
 0x1cc   : > { %v795_v3 = vpack.c.bf16 %v788_v2, %v788_v2 }
 0x1cd   : > { %v791_v0 = vld [vmem:[%s701_s16] sm:$0xf] }
 0x1ce   : > { %v800_v1 = vsel %vm628_vm2, %v791_v0, 0 }
 0x1cf   : > { %809 = vmatpush.bf16.xpose.msra.mxu3 %v800_v1 }
 0x1d6   : > { %1104 = vmatmul.msk.bf16.vlgmr.msra.gmra.mxu3 %vm628_vm2, %v795_v3 }
 0x259   : > { %v811_v7 = vpop.f32.mrf.mxu3 }
 0x25a   : > { %v815_v8 = vsel %vm628_vm2, %v811_v7, -inf }
 0x25b   : > { %816 = vmax.xlane.f32.xlu2 %v815_v8 }
 0x261   : > { %v813_v9 = vpop.f32.mrf.mxu3 }
 0x2ce   : > { %v817_v14 = vpop.xlane.xlu2 %816 }
 0x2cf   : > { %v818_v6 = vsub.f32 %v811_v7, %v817_v14 }
 0x2d1   : > { %v819_v16 = vmul.f32 1.442695, %v818_v6 }
 0x2d3   : > { %1207 = vpow2.f32 %v819_v16 }
 0x2d9   : > { %v1208_v19 = vpop.eup %1207 }
 0x2da   : > { %v821_v20 = vsel %vm628_vm2, %v1208_v19, 0.0 }
 0x2db   : > { %822 = vadd.xlane.f32.xlu2 %v821_v20 }
 0x34e   : > { %v823_v23 = vpop.xlane.xlu2 %822 }
 0x34f   : > { %1209 = vrcp.f32 %v823_v23 }
 0x355   : > { %v1210_v24 = vpop.eup %1209 }
 0x356   : > { %v825_v25 = vmul.f32 %v1210_v24, %v1208_v19 }
 0x358   : > { %v826_v26 = vpack.c.bf16 %v825_v25, %v825_v25 }
 0x35a   : > { %1105 = vmatmul.msk.bf16.vlgmr.msrb.gmra.mxu0 %vm628_vm2, %v826_v26 }
 0x3d7   : > { %v843_v27 = vpop.f32.mrf.mxu0 }
 0x3d8   : > { %v848_v28 = vpack.c.bf16 %v843_v27, %v843_v27 }
 0x3da   : > { %1106 = vmatmul.msk.bf16.vlgmr.msrb.gmra.mxu1 %vm628_vm2, %v848_v28 }
 0x3df   : > { %v845_v29 = vpop.f32.mrf.mxu0 }
 0x457   : > { %v865_v31 = vpop.f32.mrf.mxu1 }
 0x458   : > { %v869_v32 = vadd.f32 %v865_v31, %v847_v30 }
 0x45a   : > { %870 = vst.msk [vmem:[#allocation4] sm:$0xff] %vm609_vm1, %v869_v32 }
 0x45b   : > { %874 = sbr.rel (%p1107_p1) target bundleno = 1125 (0x465), region = 84 }
 0x45f   : > { %v867_v33 = vpop.f32.mrf.mxu1 }
 0x460   : > { %v1211_v35 = vld [vmem:[%s1650_s21] ss:$0 sm:$0xff] }
 0x461   : > { %v875_v34 = vld [vmem:[#allocation4] sm:$0xff] }
 0x462   : > { %v880_v36 = vadd.f32 %v1211_v35, %v875_v34 }
 0x464   : > { %881 = vst.msk [vmem:[%s543_s26] sm:$0xff] %vm609_vm1, %v880_v36 }
 0x465 PF: > { %s1651_s8 = sld [smem:[#allocation11_spill]]  ;;  %s896_s14 = sshll.u32 %s543_s26, 4  ;;  %s897_s14 = int_to_ptr.vmem [resolvable:$true] %s896_s14 }
 0x466   : > { %s1652_s12 = sld [smem:[#allocation9_spill]] }
 0x467   : > { %s1654_s28 = sld [smem:[#allocation24_spill]] }
 0x46b   : > { %s1109_s30 = sshll.u32 %s1651_s8, 3 }
 0x46c   : > { %s1656_s27 = sand.u32 1, %s1652_s12  }
 0x46d   : > { %s1655_s16 = smov %s1654_s28  ;;  %s894_s18 = scalar_lea.hbm %s1654_s28, %s1109_s30 }
 0x46e   : > { %s898_s23 = sshll.u32 %s894_s18, 4  ;;  %s883_s25 = scalar_lea.sflag [#allocation6], %s1656_s27  ;;  %s899_s23 = int_to_ptr.hbm [resolvable:$true] %s898_s23 }
 0x46f   : > { %s1226_s15 = sshra.s32 %s899_s23, 4  ;;  %s1232_s13 = scalar_lea.hbm %s1655_s16, 16  ;;  %s1227_s15 = int_to_ptr.hbm [resolvable:$true] %s1226_s15 }
 0x470   : > { %s1228_s0 = scalar_lea.hbm %s1227_s15, 8  ;;  %p1233_p6 = scmp.lt.s32.totalorder %s1227_s15, %s1655_s16 }
 0x471   : > { %p1229_p2 = scmp.ne.s32.totalorder %s1227_s15, %s1228_s0  ;;  %p1234_p7 = scmp.lt.s32.totalorder %s1232_s13, %s1228_s0 }
 0x473   : > { %p1230_p4 = pnand %p1229_p2, %p1429_p3  ;;  %p1235_p8 = por %p1234_p7, %p1233_p6 }
 0x475   : > { %p1231_p5 = pneg %p1230_p4 }
 0x477   : > { %p1236_p10 = pnand %p1235_p8, %p1231_p5 }
 0x479   : > { %1239 = shalt.err (!%p1236_p10)
}
 0x47a   : > { %1121 = dma.vmem_to_hbm [thread:$0]  (%p1429_p3), %s897_s14, 128, %s899_s23, %s883_s25  }
 0x47b PF: > { %s1657_s17 = sld [smem:[#allocation14_spill]] }
 0x47c   : > { %s1658_s26 = sld [smem:[#allocation8_spill]] }
 0x481   : > { %p1127_p11 = scmp.ge.s32.totalorder %s1657_s17, 2 }
 0x482   : > { %s910_s12 = sand.u32 1, %s1658_s26  }
 0x483   : > { %p1124_p12 = pnand %p1127_p11, %p1439_p9  ;;  %s911_s30 = scalar_lea.sflag [#allocation6], %s910_s12 }
 0x485   : > { %p1125_p13 = pneg %p1124_p12 }
 0x487   : > { %1273 = dma.done.wait (%p1125_p13), %s911_s30, 128  }
 0x488   : > { %1275 = vsyncadd (%p1125_p13), %s911_s30, 4294967168  ;;  %s26_s15 = sadd.s32 1, %s1657_s17   ;;  %s1660_s25 = sld [smem:[#allocation9_spill]] }
 0x489   : > { %p23_p0 = scmp.ge.s32.totalorder %s26_s15, 10   ;;  %s1661_s26 = sld [smem:[#allocation10_spill]] }
 0x48a   : > { %s1662_s27 = sld [smem:[#allocation19_spill]] }
 0x48b   : > { %s1663_s28 = sld [smem:[#allocation12_spill]]  ;;  %25 = sbr.rel (!%p23_p0) target bundleno = 11 (0xb), region = 145 }
 0x48c   : > { %s1664_s29 = sld [smem:[#allocation13_spill]] }
 0x48d   : > { %s1665_s30 = sld [smem:[#allocation15_spill]] }
 0x48e   : > { %s1666_s14 = sld [smem:[#allocation17_spill]] }
 0x490   :  { %917 = vsyncpa [#allocation6], 1 }
 0x491   :  { %919 = vsyncpa [#allocation6 + $0x1], 1 }

</bundles_post_ra>
